<compile_context>
chip_gen: v6e
topology: v6e:2x2x1
jax: 0.10.0
libtpu: 0.0.40
codegen_flags: <defaults>
</compile_context>

<pallas_src>
import numpy as np
import jax
import jax.numpy as jnp
from jax.experimental import pallas as pl
from jax.experimental.pallas import tpu as pltpu

# ------------------------- problem sizes (small) -----------------------------
B = 2            # batch
C = 3            # RGB channels (adjust_contrast grayscale weights assume RGB)
H = W = 16       # input spatial size
HO = WO = 32     # resize target
HID = 32         # hidden width of synthetic head
BC = B * C
CONTRAST = 1.2
INV_AREA = 1.0 / float(HO * WO)
GRAY_W = (0.2989, 0.587, 0.114)            # torchvision rgb_to_grayscale weights
NORM_MEAN = (0.485, 0.456, 0.406)          # ImageNet normalize
NORM_STD = (0.229, 0.224, 0.225)

# ---------------- packed-constant slab layouts (static row offsets) ----------
# slab96: width BC*H = 96
S96_RHBD = 0                     # (BC*HO, BC*H) block-diag row-interp operator
S96_GLEFT = BC * HO              # (B, BC*H)     gray-mean-from-x operator
S96_ROWS = S96_GLEFT + B         # 194

# slab32: width max(HID, WO, B) = 32
S32_WIDTH = max(HID, WO, B)
S32_W1ROWS = 0                   # (BC*HO, HID)  INV_AREA * (W1 with 1/std fold), tiled
S32_RWT = BC * HO                # (W, WO)       Rw^T column-interp operator
S32_BCOL = S32_RWT + W           # (BC*HO, B)    per-batch broadcast selector
S32_WWCOL = S32_BCOL + BC * HO   # (W, 1)        Rw column sums
S32_W2 = S32_WWCOL + W           # (HID, 1)
S32_W1S = S32_W2 + HID           # (1, HID)
S32_B1 = S32_W1S + 8             # (1, HID)      b1 with normalize-mean fold
S32_B2 = S32_B1 + 8              # (1, 1)
S32_ROWS = S32_B2 + 8            # 472


# ------------------------- glue: constant operators --------------------------
def bilinear_matrix(out_size: int, in_size: int) -> np.ndarray:
  """Interpolation matrix M (out, in): resized = M @ img.

  Matches PyTorch bilinear, align_corners=False (source coords clamped)."""
  i = np.arange(out_size, dtype=np.float64)
  src = (i + 0.5) * (in_size / out_size) - 0.5
  src = np.clip(src, 0.0, in_size - 1.0)
  lo = np.floor(src).astype(np.int64)
  hi = np.minimum(lo + 1, in_size - 1)
  w_hi = src - lo
  w_lo = 1.0 - w_hi
  m = np.zeros((out_size, in_size), dtype=np.float64)
  m[np.arange(out_size), lo] += w_lo
  m[np.arange(out_size), hi] += w_hi
  return m


def build_constants(w1i, w1s, b1, w2, b2, nmean, nstd):
  """One-time host-side build of the packed constant slabs (all folding here)."""
  w1i = np.asarray(w1i, np.float64)
  w1s = np.asarray(w1s, np.float64)
  b1 = np.asarray(b1, np.float64)
  w2 = np.asarray(w2, np.float64)
  b2 = np.asarray(b2, np.float64)
  nmean = np.asarray(nmean, np.float64)
  nstd = np.asarray(nstd, np.float64)
  gray = np.asarray(GRAY_W, np.float64)

  rh = bilinear_matrix(HO, H)            # (HO, H)
  rw = bilinear_matrix(WO, W)            # (WO, W)
  wh = rh.sum(axis=0)                    # (H,)  total weight per input row
  ww = rw.sum(axis=0)                    # (W,)  total weight per input col

  # Fold Normalize ((v - mean) / std) into the head weights / bias.
  ninv = 1.0 / nstd
  w1fold = w1i * ninv[:, None]                       # (C, HID)
  b1fold = b1 - (nmean * ninv) @ w1i                 # (1, HID)

  s96 = np.zeros((S96_ROWS, BC * H), np.float64)
  s32 = np.zeros((S32_ROWS, S32_WIDTH), np.float64)
  asel = np.zeros((B, BC * HO), np.float64)

  for k in range(BC):                    # plane k = b*C + c
    b_idx, c_idx = divmod(k, C)
    # block-diagonal row-interp:  resized = RhBD @ (x2d @ Rw^T)
    s96[S96_RHBD + k * HO:S96_RHBD + (k + 1) * HO, k * H:(k + 1) * H] = rh
    # gray mean straight from x:  gmean_b = Gleft @ (x2d @ ww)
    s96[S96_GLEFT + b_idx, k * H:(k + 1) * H] = gray[c_idx] * INV_AREA * wh
    # pooled->W1 head rows (normalize + 1/area folded), tiled per plane-row
    s32[S32_W1ROWS + k * HO:S32_W1ROWS + (k + 1) * HO, 0:HID] = (
        INV_AREA * w1fold[c_idx])
    # broadcast per-batch gmean back to every plane-row of that batch
    s32[S32_BCOL + k * HO:S32_BCOL + (k + 1) * HO, b_idx] = 1.0
    # per-batch row selector for the head
    asel[b_idx, k * HO:(k + 1) * HO] = 1.0

  s32[S32_RWT:S32_RWT + W, 0:WO] = rw.T
  s32[S32_WWCOL:S32_WWCOL + W, 0] = ww
  s32[S32_W2:S32_W2 + HID, 0] = w2[:, 0]
  s32[S32_W1S, 0:HID] = w1s[0]
  s32[S32_B1, 0:HID] = b1fold[0]
  s32[S32_B2, 0] = b2[0, 0]

  return (jnp.asarray(s96, jnp.float32), jnp.asarray(s32, jnp.float32),
          jnp.asarray(asel, jnp.float32),
          jnp.asarray(rh, jnp.float32), jnp.asarray(rw, jnp.float32))


# ------------------------------ Pallas kernel --------------------------------
def _fwd_kernel(x_ref, sex_ref, s96_ref, s32_ref, asel_ref, out_ref):
  """Whole batch in one grid-less step.

  x_ref   : (BC*H, W)        one image row per sublane-row (free reshape of x)
  sex_ref : (B, 1)           scalar covariate
  s96_ref : (S96_ROWS, 96)   packed: block-diag Rh operator + gray-mean operator
  s32_ref : (S32_ROWS, 32)   packed: W1 rows, Rw^T, batch selector, col-sums,
                             W2, w1s, b1(fold), b2
  asel_ref: (B, BC*HO)       per-batch plane-row selector
  out_ref : (B, 1)
  """
  x2d = x_ref[...]                                              # (BC*H, W)

  # ---- Resize: separable bilinear via two small MXU matmuls ----
  rwt = s32_ref[S32_RWT:S32_RWT + W, 0:WO]                      # (W, WO)
  rhbd = s96_ref[S96_RHBD:S96_RHBD + BC * HO, :]                # (BC*HO, BC*H)
  t1 = jnp.dot(x2d, rwt, preferred_element_type=jnp.float32)    # (BC*H, WO)
  resized = jnp.dot(rhbd, t1, preferred_element_type=jnp.float32)  # (BC*HO, WO)

  # ---- adjust_contrast(1.2): per-batch grayscale mean (computed from x
  #      directly via resize column sums -> decoupled from the resize matmuls)
  ww_col = s32_ref[S32_WWCOL:S32_WWCOL + W, 0:1]                # (W, 1)
  gleft = s96_ref[S96_GLEFT:S96_GLEFT + B, :]                   # (B, BC*H)
  bcol = s32_ref[S32_BCOL:S32_BCOL + BC * HO, 0:B]              # (BC*HO, B)
  gx = jnp.dot(x2d, ww_col, preferred_element_type=jnp.float32)       # (BC*H, 1)
  gmean_b = jnp.dot(gleft, gx, preferred_element_type=jnp.float32)    # (B, 1)
  gmean = jnp.dot(bcol, gmean_b, preferred_element_type=jnp.float32)  # (BC*HO, 1)
  y = jnp.clip(CONTRAST * resized + (1.0 - CONTRAST) * gmean, 0.0, 1.0)

  # ---- Normalize (folded into W1 rows / b1) + global avg pool + MLP head ----
  w1rows = s32_ref[S32_W1ROWS:S32_W1ROWS + BC * HO, 0:HID]      # (BC*HO, HID)
  w1s = s32_ref[S32_W1S:S32_W1S + 1, 0:HID]                     # (1, HID)
  b1f = s32_ref[S32_B1:S32_B1 + 1, 0:HID]                       # (1, HID)
  w2 = s32_ref[S32_W2:S32_W2 + HID, 0:1]                        # (HID, 1)
  b2 = s32_ref[S32_B2:S32_B2 + 1, 0:1]                          # (1, 1)

  ysum = jnp.sum(y, axis=-1, keepdims=True)                     # (BC*HO, 1)
  h_img = jnp.dot(asel_ref[...], ysum * w1rows,
                  preferred_element_type=jnp.float32)           # (B, HID)
  h = jnp.maximum(h_img + sex_ref[...] * w1s + b1f, 0.0)
  out_ref[...] = jnp.dot(h, w2, preferred_element_type=jnp.float32) + b2


# ------------------------------- wrapper --------------------------------------
@jax.jit
def model_with_transforms(x, sex, s96, s32, asel):
  b, c, h, w = x.shape
  x2d = x.reshape(b * c * h, w)          # contiguous -> free relayout

  vmem = pl.BlockSpec(memory_space=pltpu.MemorySpace.VMEM)
  return pl.pallas_call(
      _fwd_kernel,
      out_shape=jax.ShapeDtypeStruct((b, 1), jnp.float32),
      in_specs=[vmem] * 5,
      out_specs=vmem,
      cost_estimate=pl.CostEstimate(flops=1_306_880, transcendentals=0,
                                    bytes_accessed=142_608),
  )(x2d, sex, s96, s32, asel)


# --------------------------- pure-JAX reference -------------------------------
def reference(x, sex, rh, rw, nmean, nstd, w1i, w1s, b1, w2, b2):
  hp = jax.lax.Precision.HIGHEST
  resized = jnp.einsum('oh,bchw,pw->bcop', rh, x, rw, precision=hp)
  gw = jnp.asarray(GRAY_W, jnp.float32).reshape(1, C, 1, 1)
  gmean = jnp.sum(resized * gw, axis=1, keepdims=True).mean(
      axis=(-2, -1), keepdims=True)
  y = jnp.clip(CONTRAST * resized + (1.0 - CONTRAST) * gmean, 0.0, 1.0)
  y = (y - nmean.reshape(1, C, 1, 1)) / nstd.reshape(1, C, 1, 1)
  pooled = y.mean(axis=(-2, -1))                          # (B, C)
  h = jnp.maximum(jnp.dot(pooled, w1i, precision=hp)
                  + jnp.dot(sex, w1s, precision=hp) + b1, 0.0)
  return jnp.dot(h, w2, precision=hp) + b2


# ---------------------------------- main ---------------------------------------
if __name__ == "__main__":
  key = jax.random.PRNGKey(0)
  kx, ksex = jax.random.split(key)

  # inputs: image in [0, 1] (float images for torchvision transforms), sex in {0,1}
  x = jax.random.uniform(kx, (B, C, H, W), dtype=jnp.float32)
  sex = jax.random.bernoulli(ksex, 0.5, (B, 1)).astype(jnp.float32)

  # deterministic synthetic parameters for the wrapped model head
  pkey = jax.random.PRNGKey(42)
  k1, k2, k3 = jax.random.split(pkey, 3)
  w1i = jax.random.normal(k1, (C, HID), jnp.float32) * 0.1
  w1s = jax.random.normal(k2, (1, HID), jnp.float32) * 0.1
  b1 = jnp.full((1, HID), 0.01, jnp.float32)
  w2 = jax.random.normal(k3, (HID, 1), jnp.float32) * 0.1
  b2 = jnp.zeros((1, 1), jnp.float32)

  nmean = jnp.asarray(NORM_MEAN, jnp.float32)
  nstd = jnp.asarray(NORM_STD, jnp.float32)

  # one-time host-side fold + pack (hoisted out of the jitted forward path)
  s96, s32, asel, rh, rw = build_constants(w1i, w1s, b1, w2, b2, nmean, nstd)

  out = model_with_transforms(x, sex, s96, s32, asel)
  out = jax.block_until_ready(out)

  ref = reference(x, sex, rh, rw, nmean, nstd, w1i, w1s, b1, w2, b2)
  np.testing.assert_allclose(np.asarray(out), np.asarray(ref),
                             rtol=1e-4, atol=1e-4)
  print("KERNEL_OK")
</pallas_src>

<mosaic_0001>
module attributes {stable_mosaic.version = 11 : i64} {
  func.func @_fwd_kernel(%arg0: memref<96x16xf32, #tpu.memory_space<vmem>>, %arg1: memref<2x1xf32, #tpu.memory_space<vmem>>, %arg2: memref<194x96xf32, #tpu.memory_space<vmem>>, %arg3: memref<472x32xf32, #tpu.memory_space<vmem>>, %arg4: memref<2x192xf32, #tpu.memory_space<vmem>>, %arg5: memref<2x1xf32, #tpu.memory_space<vmem>>) attributes {dimension_semantics = [], scalar_prefetch = 0 : i64, scratch_operands = 0 : i64, tpu.core_type = #tpu.core_type<tc>} {
    %c0 = arith.constant 0 : index
    %c0_0 = arith.constant 0 : index
    %0 = vector.load %arg0[%c0, %c0_0] : memref<96x16xf32, #tpu.memory_space<vmem>>, vector<96x16xf32>
    %c192 = arith.constant 192 : index
    %c0_1 = arith.constant 0 : index
    %1 = vector.load %arg3[%c192, %c0_1] : memref<472x32xf32, #tpu.memory_space<vmem>>, vector<16x32xf32>
    %c0_2 = arith.constant 0 : index
    %c0_3 = arith.constant 0 : index
    %2 = vector.load %arg2[%c0_2, %c0_3] : memref<194x96xf32, #tpu.memory_space<vmem>>, vector<192x96xf32>
    %cst = arith.constant dense<0.000000e+00> : vector<96x32xf32>
    %3 = tpu.matmul %0, %1, %cst {dimension_numbers = #tpu.dot_dimension_numbers<[1], [0], [0], [1], [0, 0, 1, 1], [], []>} : vector<96x16xf32>, vector<16x32xf32>, vector<96x32xf32> -> vector<96x32xf32>
    %cst_4 = arith.constant dense<0.000000e+00> : vector<192x32xf32>
    %4 = tpu.matmul %2, %3, %cst_4 {dimension_numbers = #tpu.dot_dimension_numbers<[1], [0], [0], [1], [0, 0, 1, 1], [], []>} : vector<192x96xf32>, vector<96x32xf32>, vector<192x32xf32> -> vector<192x32xf32>
    %c400 = arith.constant 400 : index
    %c0_5 = arith.constant 0 : index
    %5 = vector.load %arg3[%c400, %c0_5] : memref<472x32xf32, #tpu.memory_space<vmem>>, vector<16x1xf32>
    %c192_6 = arith.constant 192 : index
    %c0_7 = arith.constant 0 : index
    %6 = vector.load %arg2[%c192_6, %c0_7] : memref<194x96xf32, #tpu.memory_space<vmem>>, vector<2x96xf32>
    %c208 = arith.constant 208 : index
    %c0_8 = arith.constant 0 : index
    %7 = vector.load %arg3[%c208, %c0_8] : memref<472x32xf32, #tpu.memory_space<vmem>>, vector<192x2xf32>
    %cst_9 = arith.constant dense<0.000000e+00> : vector<96x1xf32>
    %8 = tpu.matmul %0, %5, %cst_9 {dimension_numbers = #tpu.dot_dimension_numbers<[1], [0], [0], [1], [0, 0, 1, 1], [], []>} : vector<96x16xf32>, vector<16x1xf32>, vector<96x1xf32> -> vector<96x1xf32>
    %cst_10 = arith.constant dense<0.000000e+00> : vector<2x1xf32>
    %9 = tpu.matmul %6, %8, %cst_10 {dimension_numbers = #tpu.dot_dimension_numbers<[1], [0], [0], [1], [0, 0, 1, 1], [], []>} : vector<2x96xf32>, vector<96x1xf32>, vector<2x1xf32> -> vector<2x1xf32>
    %cst_11 = arith.constant dense<0.000000e+00> : vector<192x1xf32>
    %10 = tpu.matmul %7, %9, %cst_11 {dimension_numbers = #tpu.dot_dimension_numbers<[1], [0], [0], [1], [0, 0, 1, 1], [], []>} : vector<192x2xf32>, vector<2x1xf32>, vector<192x1xf32> -> vector<192x1xf32>
    %cst_12 = arith.constant 1.200000e+00 : f32
    %11 = vector.broadcast %cst_12 : f32 to vector<192x32xf32>
    %12 = arith.mulf %11, %4 : vector<192x32xf32>
    %cst_13 = arith.constant -2.000000e-01 : f32
    %13 = vector.broadcast %cst_13 : f32 to vector<192x1xf32>
    %14 = arith.mulf %13, %10 : vector<192x1xf32>
    %15 = vector.broadcast %14 : vector<192x1xf32> to vector<192x32xf32>
    %16 = arith.addf %12, %15 : vector<192x32xf32>
    %cst_14 = arith.constant 0.000000e+00 : f32
    %cst_15 = arith.constant 1.000000e+00 : f32
    %17 = vector.broadcast %cst_14 : f32 to vector<192x32xf32>
    %18 = arith.maximumf %17, %16 : vector<192x32xf32>
    %19 = vector.broadcast %cst_15 : f32 to vector<192x32xf32>
    %20 = arith.minimumf %19, %18 : vector<192x32xf32>
    %c0_16 = arith.constant 0 : index
    %c0_17 = arith.constant 0 : index
    %21 = vector.load %arg3[%c0_16, %c0_17] : memref<472x32xf32, #tpu.memory_space<vmem>>, vector<192x32xf32>
    %c448 = arith.constant 448 : index
    %c0_18 = arith.constant 0 : index
    %22 = vector.load %arg3[%c448, %c0_18] : memref<472x32xf32, #tpu.memory_space<vmem>>, vector<1x32xf32>
    %c456 = arith.constant 456 : index
    %c0_19 = arith.constant 0 : index
    %23 = vector.load %arg3[%c456, %c0_19] : memref<472x32xf32, #tpu.memory_space<vmem>>, vector<1x32xf32>
    %c416 = arith.constant 416 : index
    %c0_20 = arith.constant 0 : index
    %24 = vector.load %arg3[%c416, %c0_20] : memref<472x32xf32, #tpu.memory_space<vmem>>, vector<32x1xf32>
    %c464 = arith.constant 464 : index
    %c0_21 = arith.constant 0 : index
    %25 = vector.load %arg3[%c464, %c0_21] : memref<472x32xf32, #tpu.memory_space<vmem>>, vector<1x1xf32>
    %cst_22 = arith.constant dense<0.000000e+00> : vector<192xf32>
    %26 = vector.multi_reduction <add>, %20, %cst_22 [1] : vector<192x32xf32> to vector<192xf32>
    %27 = vector.shape_cast %26 : vector<192xf32> to vector<192x1xf32>
    %c0_23 = arith.constant 0 : index
    %c0_24 = arith.constant 0 : index
    %28 = vector.load %arg4[%c0_23, %c0_24] : memref<2x192xf32, #tpu.memory_space<vmem>>, vector<2x192xf32>
    %29 = vector.broadcast %27 : vector<192x1xf32> to vector<192x32xf32>
    %30 = arith.mulf %29, %21 : vector<192x32xf32>
    %cst_25 = arith.constant dense<0.000000e+00> : vector<2x32xf32>
    %31 = tpu.matmul %28, %30, %cst_25 {dimension_numbers = #tpu.dot_dimension_numbers<[1], [0], [0], [1], [0, 0, 1, 1], [], []>} : vector<2x192xf32>, vector<192x32xf32>, vector<2x32xf32> -> vector<2x32xf32>
    %c0_26 = arith.constant 0 : index
    %c0_27 = arith.constant 0 : index
    %32 = vector.load %arg1[%c0_26, %c0_27] : memref<2x1xf32, #tpu.memory_space<vmem>>, vector<2x1xf32>
    %33 = vector.broadcast %32 : vector<2x1xf32> to vector<2x32xf32>
    %34 = vector.broadcast %22 : vector<1x32xf32> to vector<2x32xf32>
    %35 = arith.mulf %33, %34 : vector<2x32xf32>
    %36 = arith.addf %31, %35 : vector<2x32xf32>
    %37 = vector.broadcast %23 : vector<1x32xf32> to vector<2x32xf32>
    %38 = arith.addf %36, %37 : vector<2x32xf32>
    %cst_28 = arith.constant 0.000000e+00 : f32
    %39 = vector.broadcast %cst_28 : f32 to vector<2x32xf32>
    %40 = arith.maximumf %38, %39 : vector<2x32xf32>
    %cst_29 = arith.constant dense<0.000000e+00> : vector<2x1xf32>
    %41 = tpu.matmul %40, %24, %cst_29 {dimension_numbers = #tpu.dot_dimension_numbers<[1], [0], [0], [1], [0, 0, 1, 1], [], []>} : vector<2x32xf32>, vector<32x1xf32>, vector<2x1xf32> -> vector<2x1xf32>
    %42 = vector.broadcast %25 : vector<1x1xf32> to vector<2x1xf32>
    %43 = arith.addf %41, %42 : vector<2x1xf32>
    %c0_30 = arith.constant 0 : index
    %c0_31 = arith.constant 0 : index
    %44 = vector.load %arg5[%c0_30, %c0_31] : memref<2x1xf32, #tpu.memory_space<vmem>>, vector<2x1xf32>
    tpu.vector_store %arg5[%c0_30, %c0_31], %43 {strides = array<i32>} : memref<2x1xf32, #tpu.memory_space<vmem>>, vector<2x1xf32>,
    return
  }
}

</mosaic_0001>

<bundles_post_ra>
// kernel: model_with_transforms.1
= control target key start
LH: loop header
LB: loop body
LE: loop exit
PB: predicated region body
PF: predicated region fallthrough
CT: control target
= control target key end

     0   :  { %vm58_vm0 = vcmask 130048   ;;  %v1889_v14 = vmov 0.0   ;;  %vm1890_vm1 = vmmov 0   ;;  %vm220_vm2 = vcmask 785408   ;;  %s2396_s3 = inlined_call_operand.vmem [shape: f32[472,32], index: 3, kind: input, shape index: {}]   ;;  %s2397_s0 = inlined_call_operand.vmem [shape: f32[96,16], index: 0, kind: input, shape index: {}]   ;;  %s2398_s2 = inlined_call_operand.vmem [shape: f32[194,96], index: 2, kind: input, shape index: {}]   ;;  %s2399_s1 = inlined_call_operand.vmem [shape: f32[2,1], index: 1, kind: input, shape index: {}]   ;;  %s2400_s4 = inlined_call_operand.vmem [shape: f32[2,192], index: 4, kind: input, shape index: {}]   ;;  %s2401_s5 = inlined_call_operand.vmem [shape: f32[2,1], index: 5, kind: output, shape index: {}]  }
   0x1   :  { %v479_v0 = vld [vmem:[%s2396_s3 + $0x198] sm:$0xff]  ;;  %v478_v1 = vld [vmem:[%s2396_s3 + $0x190] sm:$0xff]  ;;  %v20_v2 = vld [vmem:[%s2397_s0] sm:$0xff]  ;;  %vm703_vm3 = vcmask 15360   ;;  %vm776_vm4 = vcmask 1041408   ;;  %vm1236_vm5 = vcmask 261120  }
   0x2   :  { %1786 = vmatprep.subr.mxu0 %v479_v0  ;;  %1790 = vmatprep.mubr.msk.f32.mxu0 %vm58_vm0, %v20_v2  ;;  %v21_v3 = vld [vmem:[%s2397_s0 + $0x8] sm:$0xff]  ;;  %v22_v4 = vld [vmem:[%s2397_s0 + $0x10] sm:$0xff]  ;;  %v23_v5 = vld [vmem:[%s2397_s0 + $0x18] sm:$0xff]  ;;  %vm1355_vm6 = vcmask 523264   ;;  %vm1511_vm7 = vcmask 1024  }
   0x3   :  { %1787 = vmatpush3.msra.mxu0 %v479_v0  ;;  %1708 = vmatprep.mubr.msk.f32.mxu1 %vm58_vm0, %v20_v2  ;;  %v24_v6 = vld [vmem:[%s2397_s0 + $0x20] sm:$0xff]  ;;  %v25_v7 = vld [vmem:[%s2397_s0 + $0x28] sm:$0xff]  ;;  %v26_v8 = vld [vmem:[%s2397_s0 + $0x30] sm:$0xff] }
   0x4   :  { %1788 = vmatprep.subr.mxu0 %v478_v1  ;;  %v27_v9 = vld [vmem:[%s2397_s0 + $0x38] sm:$0xff]  ;;  %v28_v10 = vld [vmem:[%s2397_s0 + $0x40] sm:$0xff]  ;;  %v29_v11 = vld [vmem:[%s2397_s0 + $0x48] sm:$0xff] }
   0x5   :  { %1789 = vmatpush3.msra.mxu0 %v478_v1  ;;  %v30_v12 = vld [vmem:[%s2397_s0 + $0x50] sm:$0xff]  ;;  %v31_v13 = vld [vmem:[%s2397_s0 + $0x58] sm:$0xff]  ;;  %v33_v15 = vld [vmem:[%s2396_s3 + $0xc8] sm:$0xff] }
   0x6   :  { %1791 = vmatmul.mubr.msk.f32.vlgmr.msra.gmra.mxu0 %vm58_vm0, %v21_v3  ;;  %1808 = vmatprep.subr.mxu0 %v1889_v14  ;;  %v32_v16 = vld [vmem:[%s2396_s3 + $0xc0] sm:$0xff]  ;;  %v481_v30 = vld [vmem:[%s2396_s3 + $0xd0] sm:$0xff]  ;;  %v35_v44 = vld [vmem:[%s2398_s2 + $0x8] sm:$0xff] }
   0x7   :  { %1793 = vmatprep.mubr.msk.f32.mxu0 %vm58_vm0, %v22_v4  ;;  %1704 = vmatprep.subr.mxu1 %v33_v15  ;;  %v480_v29 = vld [vmem:[%s2398_s2 + $0xc0] sm:$0x3]  ;;  %v36_v45 = vld [vmem:[%s2398_s2 + $0x10] sm:$0xff]  ;;  %v37_v46 = vld [vmem:[%s2398_s2 + $0x18] sm:$0xff] }
   0x8   :  { %1705 = vmatpush3.msra.mxu1 %v33_v15  ;;  %v34_v37 = vld [vmem:[%s2398_s2] sm:$0xff]  ;;  %v39_v48 = vld [vmem:[%s2398_s2 + $0x28] sm:$0xff]  ;;  %v40_v49 = vld [vmem:[%s2398_s2 + $0x30] sm:$0xff] }
   0x9   :  { %1706 = vmatprep.subr.mxu1 %v32_v16  ;;  %v38_v47 = vld [vmem:[%s2398_s2 + $0x20] sm:$0xff]  ;;  %v41_v50 = vld [vmem:[%s2398_s2 + $0x38] sm:$0xff]  ;;  %v43_v52 = vld [vmem:[%s2398_s2 + $0x48] sm:$0xff] }
   0xa   :  { %1794 = vmatmul.mubr.msk.f32.gmra.mxu0 %vm58_vm0, %v23_v5  ;;  %1707 = vmatpush3.msra.mxu1 %v32_v16  ;;  %v42_v51 = vld [vmem:[%s2398_s2 + $0x40] sm:$0xff]  ;;  %v44_v53 = vld [vmem:[%s2398_s2 + $0x50] sm:$0xff]  ;;  %v45_v54 = vld [vmem:[%s2398_s2 + $0x58] sm:$0xff] }
   0xb   :  { %1796 = vmatprep.mubr.msk.f32.mxu0 %vm58_vm0, %v24_v6  ;;  %1709 = vmatmul.mubr.msk.f32.vlgmr.msra.gmra.mxu1 %vm58_vm0, %v21_v3  ;;  %v46_v55 = vld [vmem:[%s2398_s2 + $0x60] sm:$0xff]  ;;  %v47_v56 = vld [vmem:[%s2398_s2 + $0x68] sm:$0xff]  ;;  %v48_v57 = vld [vmem:[%s2398_s2 + $0x70] sm:$0xff] }
   0xc   :  { %1711 = vmatprep.mubr.msk.f32.mxu1 %vm58_vm0, %v22_v4  ;;  %v49_v58 = vld [vmem:[%s2398_s2 + $0x78] sm:$0xff]  ;;  %v50_v59 = vld [vmem:[%s2398_s2 + $0x80] sm:$0xff]  ;;  %v51_v60 = vld [vmem:[%s2398_s2 + $0x88] sm:$0xff] }
   0xd   :  { %v52_v61 = vld [vmem:[%s2398_s2 + $0x90] sm:$0xff]  ;;  %v53_v62 = vld [vmem:[%s2398_s2 + $0x98] sm:$0xff]  ;;  %v54_v63 = vld [vmem:[%s2398_s2 + $0xa0] sm:$0xff] }
   0xe   :  { %1797 = vmatmul.mubr.msk.f32.gmra.mxu0 %vm58_vm0, %v25_v7  ;;  %v55_v0 = vld [vmem:[%s2398_s2 + $0xa8] sm:$0xff]  ;;  %v56_v1 = vld [vmem:[%s2398_s2 + $0xb0] sm:$0xff]  ;;  %v57_v2 = vld [vmem:[%s2398_s2 + $0xb8] sm:$0xff] }
   0xf   :  { %1799 = vmatprep.mubr.msk.f32.mxu0 %vm58_vm0, %v26_v8  ;;  %1712 = vmatmul.mubr.msk.f32.gmra.mxu1 %vm58_vm0, %v23_v5  ;;  %v482_v4 = vld [vmem:[%s2396_s3 + $0xd8] sm:$0xff]  ;;  %v483_v5 = vld [vmem:[%s2396_s3 + $0xe0] sm:$0xff]  ;;  %v492_v16 = vld [vmem:[%s2396_s3 + $0x128] sm:$0xff] }
  0x10   :  { %1714 = vmatprep.mubr.msk.f32.mxu1 %vm58_vm0, %v24_v6  ;;  %v491_v15 = vld [vmem:[%s2396_s3 + $0x120] sm:$0xff] }
  0x12   :  { %1800 = vmatmul.mubr.msk.f32.gmra.mxu0 %vm58_vm0, %v27_v9 }
  0x13   :  { %1802 = vmatprep.mubr.msk.f32.mxu0 %vm58_vm0, %v28_v10  ;;  %1715 = vmatmul.mubr.msk.f32.gmra.mxu1 %vm58_vm0, %v25_v7  ;;  %v484_v7 = vld [vmem:[%s2396_s3 + $0xe8] sm:$0xff] }
  0x14   :  { %1717 = vmatprep.mubr.msk.f32.mxu1 %vm58_vm0, %v26_v8  ;;  %v485_v8 = vld [vmem:[%s2396_s3 + $0xf0] sm:$0xff] }
  0x16   :  { %1803 = vmatmul.mubr.msk.f32.gmra.mxu0 %vm58_vm0, %v29_v11 }
  0x17   :  { %1805 = vmatprep.mubr.msk.f32.mxu0 %vm58_vm0, %v30_v12  ;;  %1718 = vmatmul.mubr.msk.f32.gmra.mxu1 %vm58_vm0, %v27_v9  ;;  %v486_v9 = vld [vmem:[%s2396_s3 + $0xf8] sm:$0xff] }
  0x18   :  { %1720 = vmatprep.mubr.msk.f32.mxu1 %vm58_vm0, %v28_v10  ;;  %v487_v10 = vld [vmem:[%s2396_s3 + $0x100] sm:$0xff] }
  0x1a   :  { %1806 = vmatmul.mubr.msk.f32.gmra.mxu0 %vm58_vm0, %v31_v13 }
  0x1b   :  { %1832 = vmatprep.mubr.msk.f32.mxu0 %vm1890_vm1, %v1889_v14  ;;  %1721 = vmatmul.mubr.msk.f32.gmra.mxu1 %vm58_vm0, %v29_v11  ;;  %v488_v11 = vld [vmem:[%s2396_s3 + $0x108] sm:$0xff] }
  0x1c   :  { %1723 = vmatprep.mubr.msk.f32.mxu1 %vm58_vm0, %v30_v12  ;;  %v489_v12 = vld [vmem:[%s2396_s3 + $0x110] sm:$0xff] }
  0x1f   :  { %1724 = vmatmul.mubr.msk.f32.gmra.mxu1 %vm58_vm0, %v31_v13  ;;  %v490_v13 = vld [vmem:[%s2396_s3 + $0x118] sm:$0xff] }
  0x20   :  { %1750 = vmatprep.mubr.msk.f32.mxu1 %vm220_vm2, %v34_v37 }
  0xc6   :  { %v1792_v17 = vpop.f32.mrf.mxu0 }
  0xc8   :  { %v571_v18 = vpop.f32.mrf.mxu0 }
  0xca   :  { %v1795_v19 = vpop.f32.mrf.mxu0 }
  0xcb   :  { %v1710_v31 = vpop.f32.mrf.mxu1 }
  0xcc   :  { %v581_v20 = vpop.f32.mrf.mxu0 }
  0xcd   :  { %v161_v32 = vpop.f32.mrf.mxu1 }
  0xce   :  { %v1798_v21 = vpop.f32.mrf.mxu0 }
  0xcf   :  { %v1713_v33 = vpop.f32.mrf.mxu1 }
  0xd0   :  { %v591_v22 = vpop.f32.mrf.mxu0 }
  0xd1   :  { %v171_v34 = vpop.f32.mrf.mxu1 }
  0xd2   :  { %v1801_v23 = vpop.f32.mrf.mxu0 }
  0xd3   :  { %v1716_v35 = vpop.f32.mrf.mxu1 }
  0xd4   :  { %v601_v24 = vpop.f32.mrf.mxu0 }
  0xd5   :  { %v181_v36 = vpop.f32.mrf.mxu1 }
  0xd6   :  { %v1804_v25 = vpop.f32.mrf.mxu0 }
  0xd7   :  { %v1719_v38 = vpop.f32.mrf.mxu1 }
  0xd8   :  { %v611_v26 = vpop.f32.mrf.mxu0 }
  0xd9   :  { %v191_v39 = vpop.f32.mrf.mxu1 }
  0xda   :  { %v1807_v27 = vpop.f32.mrf.mxu0 }
  0xdb   :  { %1809 = vmatpush3.msra.mxu0 %v1807_v27  ;;  %v1722_v40 = vpop.f32.mrf.mxu1  ;;  %v503_v27 = vld [vmem:[%s2396_s3 + $0x180] sm:$0xff] }
  0xdc   :  { %v621_v28 = vpop.f32.mrf.mxu0  ;;  %1810 = vmatprep.subr.mxu0 %v1889_v14 }
  0xdd   :  { %1811 = vmatpush3.msra.mxu0 %v621_v28  ;;  %v201_v41 = vpop.f32.mrf.mxu1  ;;  %v504_v28 = vld [vmem:[%s2396_s3 + $0x188] sm:$0xff] }
  0xde   :  { %1812 = vmatprep.subr.mxu0 %v1889_v14 }
  0xdf   :  { %1813 = vmatpush3.msra.mxu0 %v1804_v25  ;;  %v1725_v42 = vpop.f32.mrf.mxu1  ;;  %v501_v25 = vld [vmem:[%s2396_s3 + $0x170] sm:$0xff] }
  0xe0   :  { %1814 = vmatprep.subr.mxu0 %v1889_v14  ;;  %1726 = vmatprep.subr.mxu1 %v1725_v42 }
  0xe1   :  { %1815 = vmatpush3.msra.mxu0 %v611_v26  ;;  %v211_v43 = vpop.f32.mrf.mxu1  ;;  %1727 = vmatpush3.msra.mxu1 %v1725_v42  ;;  %v502_v26 = vld [vmem:[%s2396_s3 + $0x178] sm:$0xff] }
  0xe2   :  { %1816 = vmatprep.subr.mxu0 %v1889_v14  ;;  %1728 = vmatprep.subr.mxu1 %v211_v43 }
  0xe3   :  { %1817 = vmatpush3.msra.mxu0 %v1801_v23  ;;  %1729 = vmatpush3.msra.mxu1 %v211_v43  ;;  %v499_v23 = vld [vmem:[%s2396_s3 + $0x160] sm:$0xff] }
  0xe4   :  { %1818 = vmatprep.subr.mxu0 %v1889_v14  ;;  %1730 = vmatprep.subr.mxu1 %v1722_v40 }
  0xe5   :  { %1819 = vmatpush3.msra.mxu0 %v601_v24  ;;  %1731 = vmatpush3.msra.mxu1 %v1722_v40  ;;  %v500_v24 = vld [vmem:[%s2396_s3 + $0x168] sm:$0xff] }
  0xe6   :  { %1820 = vmatprep.subr.mxu0 %v1889_v14  ;;  %1732 = vmatprep.subr.mxu1 %v201_v41 }
  0xe7   :  { %1821 = vmatpush3.msra.mxu0 %v1798_v21  ;;  %1733 = vmatpush3.msra.mxu1 %v201_v41  ;;  %v497_v21 = vld [vmem:[%s2396_s3 + $0x150] sm:$0xff] }
  0xe8   :  { %1822 = vmatprep.subr.mxu0 %v1889_v14  ;;  %1734 = vmatprep.subr.mxu1 %v1719_v38 }
  0xe9   :  { %1823 = vmatpush3.msra.mxu0 %v591_v22  ;;  %1735 = vmatpush3.msra.mxu1 %v1719_v38  ;;  %v498_v22 = vld [vmem:[%s2396_s3 + $0x158] sm:$0xff] }
  0xea   :  { %1824 = vmatprep.subr.mxu0 %v1889_v14  ;;  %1736 = vmatprep.subr.mxu1 %v191_v39 }
  0xeb   :  { %1825 = vmatpush3.msra.mxu0 %v1795_v19  ;;  %1737 = vmatpush3.msra.mxu1 %v191_v39  ;;  %v495_v19 = vld [vmem:[%s2396_s3 + $0x140] sm:$0xff] }
  0xec   :  { %1826 = vmatprep.subr.mxu0 %v1889_v14  ;;  %1738 = vmatprep.subr.mxu1 %v1716_v35 }
  0xed   :  { %1827 = vmatpush3.msra.mxu0 %v581_v20  ;;  %1739 = vmatpush3.msra.mxu1 %v1716_v35  ;;  %v496_v20 = vld [vmem:[%s2396_s3 + $0x148] sm:$0xff] }
  0xee   :  { %1828 = vmatprep.subr.mxu0 %v1889_v14  ;;  %1740 = vmatprep.subr.mxu1 %v181_v36 }
  0xef   :  { %1829 = vmatpush3.msra.mxu0 %v1792_v17  ;;  %1741 = vmatpush3.msra.mxu1 %v181_v36  ;;  %v493_v17 = vld [vmem:[%s2396_s3 + $0x130] sm:$0xff] }
  0xf0   :  { %1830 = vmatprep.subr.mxu0 %v1889_v14  ;;  %1742 = vmatprep.subr.mxu1 %v1713_v33 }
  0xf1   :  { %1831 = vmatpush3.msra.mxu0 %v571_v18  ;;  %1743 = vmatpush3.msra.mxu1 %v1713_v33  ;;  %v494_v18 = vld [vmem:[%s2396_s3 + $0x138] sm:$0xff] }
  0xf2   :  { %1833 = vmatmul.mubr.msk.f32.vlgmr.msra.gmra.mxu0 %vm220_vm2, %v480_v29  ;;  %1744 = vmatprep.subr.mxu1 %v171_v34  ;;  %v1891_v29 = vmov 0  }
  0xf3   :  { %1837 = vmatprep.mubr.msk.f32.mxu0 %vm703_vm3, %v481_v30  ;;  %1745 = vmatpush3.msra.mxu1 %v171_v34 }
  0xf4   :  { %1746 = vmatprep.subr.mxu1 %v1710_v31  ;;  %1887 = vset.pattern.permute.xlu0 %v1891_v29 }
  0xf5   :  { %1747 = vmatpush3.msra.mxu1 %v1710_v31  ;;  %1888 = vset.pattern.permute.xlu1 %v1891_v29 }
  0xf6   :  { %1748 = vmatprep.subr.mxu1 %v161_v32 }
  0xf7   :  { %1749 = vmatpush3.msra.mxu1 %v161_v32 }
  0xf8   :  { %1751 = vmatmul.mubr.msk.f32.vlgmr.msra.gmra.mxu1 %vm220_vm2, %v35_v44  ;;  %1873 = vmatprep.subr.mxu1 %v1889_v14 }
  0xf9   :  { %1753 = vmatprep.mubr.msk.f32.mxu1 %vm220_vm2, %v36_v45 }
  0xfc   :  { %1754 = vmatmul.mubr.msk.f32.gmra.mxu1 %vm220_vm2, %v37_v46 }
  0xfd   :  { %1756 = vmatprep.mubr.msk.f32.mxu1 %vm220_vm2, %v38_v47 }
 0x100   :  { %1757 = vmatmul.mubr.msk.f32.gmra.mxu1 %vm220_vm2, %v39_v48 }
 0x101   :  { %1759 = vmatprep.mubr.msk.f32.mxu1 %vm220_vm2, %v40_v49 }
 0x104   :  { %1760 = vmatmul.mubr.msk.f32.gmra.mxu1 %vm220_vm2, %v41_v50 }
 0x105   :  { %1762 = vmatprep.mubr.msk.f32.mxu1 %vm220_vm2, %v42_v51 }
 0x108   :  { %1763 = vmatmul.mubr.msk.f32.gmra.mxu1 %vm220_vm2, %v43_v52 }
 0x109   :  { %1765 = vmatprep.mubr.msk.f32.mxu1 %vm220_vm2, %v44_v53 }
 0x10c   :  { %1766 = vmatmul.mubr.msk.f32.gmra.mxu1 %vm220_vm2, %v45_v54 }
 0x10d   :  { %1768 = vmatprep.mubr.msk.f32.mxu1 %vm220_vm2, %v46_v55 }
 0x110   :  { %1769 = vmatmul.mubr.msk.f32.gmra.mxu1 %vm220_vm2, %v47_v56 }
 0x111   :  { %1771 = vmatprep.mubr.msk.f32.mxu1 %vm220_vm2, %v48_v57 }
 0x114   :  { %1772 = vmatmul.mubr.msk.f32.gmra.mxu1 %vm220_vm2, %v49_v58 }
 0x115   :  { %1774 = vmatprep.mubr.msk.f32.mxu1 %vm220_vm2, %v50_v59 }
 0x118   :  { %1775 = vmatmul.mubr.msk.f32.gmra.mxu1 %vm220_vm2, %v51_v60 }
 0x119   :  { %1777 = vmatprep.mubr.msk.f32.mxu1 %vm220_vm2, %v52_v61 }
 0x11c   :  { %1778 = vmatmul.mubr.msk.f32.gmra.mxu1 %vm220_vm2, %v53_v62 }
 0x11d   :  { %1780 = vmatprep.mubr.msk.f32.mxu1 %vm220_vm2, %v54_v63 }
 0x120   :  { %1781 = vmatmul.mubr.msk.f32.gmra.mxu1 %vm220_vm2, %v55_v0 }
 0x121   :  { %1783 = vmatprep.mubr.msk.f32.mxu1 %vm220_vm2, %v56_v1 }
 0x124   :  { %1784 = vmatmul.mubr.msk.f32.gmra.mxu1 %vm220_vm2, %v57_v2 }
 0x125   :  { %1881 = vmatprep.mubr.msk.f32.mxu1 %vm1890_vm1, %v1889_v14 }
 0x1b2   :  { %v699_v3 = vpop.f32.mrf.mxu0 }
 0x1b3   :  { %1835 = vmatprep.subr.msk.mxu0 %vm776_vm4, %v699_v3 }
 0x1b4   :  { %v1834_v6 = vpop.f32.mrf.mxu0  ;;  %1836 = vmatpush3.msk.msra.mxu0 %vm776_vm4, %v699_v3 }
 0x1b5   :  { %1838 = vmatmul.mubr.msk.f32.vlgmr.msra.gmra.mxu0 %vm703_vm3, %v482_v4  ;;  %1358 = vmatprep.subr.mxu0 %v1889_v14 }
 0x1b6   :  { %1840 = vmatprep.mubr.msk.f32.mxu0 %vm703_vm3, %v483_v5 }
 0x1b9   :  { %1841 = vmatmul.mubr.msk.f32.gmra.mxu0 %vm703_vm3, %v484_v7 }
 0x1ba   :  { %1843 = vmatprep.mubr.msk.f32.mxu0 %vm703_vm3, %v485_v8 }
 0x1bd   :  { %1844 = vmatmul.mubr.msk.f32.gmra.mxu0 %vm703_vm3, %v486_v9 }
 0x1be   :  { %1846 = vmatprep.mubr.msk.f32.mxu0 %vm703_vm3, %v487_v10 }
 0x1c1   :  { %1847 = vmatmul.mubr.msk.f32.gmra.mxu0 %vm703_vm3, %v488_v11 }
 0x1c2   :  { %1849 = vmatprep.mubr.msk.f32.mxu0 %vm703_vm3, %v489_v12 }
 0x1c5   :  { %1850 = vmatmul.mubr.msk.f32.gmra.mxu0 %vm703_vm3, %v490_v13 }
 0x1c6   :  { %1852 = vmatprep.mubr.msk.f32.mxu0 %vm703_vm3, %v491_v15  ;;  %v2208_v15 = vpop.f32.mrf.mxu1 }
 0x1c9   :  { %1853 = vmatmul.mubr.msk.f32.gmra.mxu0 %vm703_vm3, %v492_v16  ;;  %v2210_v16 = vpop.f32.mrf.mxu1 }
 0x1ca   :  { %1855 = vmatprep.mubr.msk.f32.mxu0 %vm703_vm3, %v493_v17 }
 0x1cb   :  { %v2212_v17 = vpop.f32.mrf.mxu1 }
 0x1cd   :  { %1856 = vmatmul.mubr.msk.f32.gmra.mxu0 %vm703_vm3, %v494_v18  ;;  %v2214_v18 = vpop.f32.mrf.mxu1 }
 0x1ce   :  { %1858 = vmatprep.mubr.msk.f32.mxu0 %vm703_vm3, %v495_v19 }
 0x1cf   :  { %v2216_v19 = vpop.f32.mrf.mxu1 }
 0x1d1   :  { %1859 = vmatmul.mubr.msk.f32.gmra.mxu0 %vm703_vm3, %v496_v20  ;;  %v2218_v20 = vpop.f32.mrf.mxu1 }
 0x1d2   :  { %1861 = vmatprep.mubr.msk.f32.mxu0 %vm703_vm3, %v497_v21 }
 0x1d3   :  { %v1761_v21 = vpop.f32.mrf.mxu1 }
 0x1d5   :  { %1862 = vmatmul.mubr.msk.f32.gmra.mxu0 %vm703_vm3, %v498_v22  ;;  %v389_v22 = vpop.f32.mrf.mxu1 }
 0x1d6   :  { %1864 = vmatprep.mubr.msk.f32.mxu0 %vm703_vm3, %v499_v23 }
 0x1d7   :  { %v1764_v23 = vpop.f32.mrf.mxu1 }
 0x1d9   :  { %1865 = vmatmul.mubr.msk.f32.gmra.mxu0 %vm703_vm3, %v500_v24  ;;  %v399_v24 = vpop.f32.mrf.mxu1 }
 0x1da   :  { %1867 = vmatprep.mubr.msk.f32.mxu0 %vm703_vm3, %v501_v25 }
 0x1db   :  { %v1767_v25 = vpop.f32.mrf.mxu1 }
 0x1dd   :  { %1868 = vmatmul.mubr.msk.f32.gmra.mxu0 %vm703_vm3, %v502_v26  ;;  %v409_v26 = vpop.f32.mrf.mxu1 }
 0x1de   :  { %1870 = vmatprep.mubr.msk.f32.mxu0 %vm703_vm3, %v503_v27 }
 0x1df   :  { %v1770_v27 = vpop.f32.mrf.mxu1 }
 0x1e1   :  { %1871 = vmatmul.mubr.msk.f32.gmra.mxu0 %vm703_vm3, %v504_v28  ;;  %v419_v28 = vpop.f32.mrf.mxu1 }
 0x275   :  { %v1839_v30 = vpop.f32.mrf.mxu0 }
 0x276   :  { %v990_v2 = vmul.f32 -0.2, %v1839_v30  ;;  %v1773_v30 = vpop.f32.mrf.mxu1 }
 0x277   :  { %v846_v31 = vpop.f32.mrf.mxu0 }
 0x278   :  { %v989_v6 = vmul.f32 -0.2, %v846_v31 }
 0x279   :  { %v1842_v32 = vpop.f32.mrf.mxu0 }
 0x27a   :  { %v992_v63 = vmul.f32 -0.2, %v1842_v32 }
 0x27b   :  { %v856_v33 = vpop.f32.mrf.mxu0 }
 0x27c   :  { %v991_v3 = vmul.f32 -0.2, %v856_v33  ;;  %v429_v33 = vpop.f32.mrf.mxu1 }
 0x27d   :  { %v1845_v34 = vpop.f32.mrf.mxu0 }
 0x27e   :  { %v994_v52 = vmul.f32 -0.2, %v1845_v34 }
 0x27f   :  { %v866_v35 = vpop.f32.mrf.mxu0 }
 0x280   :  { %v993_v0 = vmul.f32 -0.2, %v866_v35 }
 0x281   :  { %v1848_v36 = vpop.f32.mrf.mxu0 }
 0x282   :  { %v996_v49 = vmul.f32 -0.2, %v1848_v36  ;;  %v978_v36 = vmul.f32 1.2, %v1770_v27 }
 0x283   :  { %v876_v37 = vpop.f32.mrf.mxu0 }
 0x284   :  { %v995_v60 = vmul.f32 -0.2, %v876_v37  ;;  %v2220_v37 = vpop.f32.mrf.mxu1 }
 0x285   :  { %v1851_v38 = vpop.f32.mrf.mxu0 }
 0x286   :  { %v998_v44 = vmul.f32 -0.2, %v1851_v38 }
 0x287   :  { %v886_v39 = vpop.f32.mrf.mxu0 }
 0x288   :  { %v997_v57 = vmul.f32 -0.2, %v886_v39 }
 0x289   :  { %v1854_v40 = vpop.f32.mrf.mxu0 }
 0x28a   :  { %v1000_v41 = vmul.f32 -0.2, %v1854_v40  ;;  %v980_v40 = vmul.f32 1.2, %v1773_v30 }
 0x28b   :  { %v896_v42 = vpop.f32.mrf.mxu0 }
 0x28c   :  { %1070 = vperm.xlu0 %1887, %v1000_v41   ;;  %v999_v53 = vmul.f32 -0.2, %v896_v42  ;;  %v976_v41 = vmul.f32 1.2, %v1767_v25 }
 0x28d   :  { %v1857_v43 = vpop.f32.mrf.mxu0 }
 0x28e   :  { %v1002_v45 = vmul.f32 -0.2, %v1857_v43  ;;  %v2222_v43 = vpop.f32.mrf.mxu1 }
 0x28f   :  { %v906_v46 = vpop.f32.mrf.mxu0 }
 0x290   :  { %1060 = vperm.xlu0 %1887, %v998_v44   ;;  %1080 = vperm.xlu1 %1888, %v1002_v45   ;;  %v1001_v47 = vmul.f32 -0.2, %v906_v46  ;;  %v977_v44 = vmul.f32 1.2, %v419_v28  ;;  %v970_v28 = vmul.f32 1.2, %v2216_v19 }
 0x291   :  { %v1860_v48 = vpop.f32.mrf.mxu0  ;;  %v968_v19 = vmul.f32 1.2, %v2212_v17 }
 0x292   :  { %v1004_v55 = vmul.f32 -0.2, %v1860_v48  ;;  %v974_v48 = vmul.f32 1.2, %v1764_v23 }
 0x293   :  { %v916_v50 = vpop.f32.mrf.mxu0 }
 0x294   :  { %1050 = vperm.xlu0 %1887, %v996_v49   ;;  %1075 = vperm.xlu1 %1888, %v1001_v47   ;;  %v1003_v61 = vmul.f32 -0.2, %v916_v50  ;;  %v2224_v50 = vpop.f32.mrf.mxu1 }
 0x295   :  { %v1863_v51 = vpop.f32.mrf.mxu0 }
 0x296   :  { %v1006_v11 = vmul.f32 -0.2, %v1863_v51 }
 0x297   :  { %v926_v54 = vpop.f32.mrf.mxu0 }
 0x298   :  { %1040 = vperm.xlu0 %1887, %v994_v52   ;;  %1065 = vperm.xlu1 %1888, %v999_v53   ;;  %v1005_v13 = vmul.f32 -0.2, %v926_v54  ;;  %v979_v54 = vmul.f32 1.2, %v429_v33 }
 0x299   :  { %v1866_v56 = vpop.f32.mrf.mxu0 }
 0x29a   :  { %v1008_v9 = vmul.f32 -0.2, %v1866_v56 }
 0x29b   :  { %v936_v58 = vpop.f32.mrf.mxu0 }
 0x29c   :  { %1055 = vperm.xlu1 %1888, %v997_v57   ;;  %1090 = vperm.xlu0 %1887, %v1004_v55   ;;  %v1007_v12 = vmul.f32 -0.2, %v936_v58  ;;  %v975_v57 = vmul.f32 1.2, %v409_v26 }
 0x29d   :  { %v1869_v59 = vpop.f32.mrf.mxu0 }
 0x29e   :  { %v1010_v4 = vmul.f32 -0.2, %v1869_v59 }
 0x29f   :  { %v946_v62 = vpop.f32.mrf.mxu0 }
 0x2a0   :  { %1045 = vperm.xlu1 %1888, %v995_v60   ;;  %1085 = vperm.xlu0 %1887, %v1003_v61   ;;  %v1009_v10 = vmul.f32 -0.2, %v946_v62  ;;  %v2226_v61 = vpop.f32.mrf.mxu1 }
 0x2a1   :  { %v1872_v1 = vpop.f32.mrf.mxu0 }
 0x2a2   :  { %v1012_v7 = vmul.f32 -0.2, %v1872_v1 }
 0x2a3   :  { %v956_v5 = vpop.f32.mrf.mxu0 }
 0x2a4   :  { %1035 = vperm.xlu1 %1888, %v993_v0   ;;  %1030 = vperm.xlu0 %1887, %v992_v63   ;;  %v1011_v8 = vmul.f32 -0.2, %v956_v5 }
 0x2a8   :  { %1025 = vperm.xlu1 %1888, %v991_v3   ;;  %1020 = vperm.xlu0 %1887, %v990_v2  }
 0x2ac   :  { %1015 = vperm.xlu1 %1888, %v989_v6   ;;  %1120 = vperm.xlu0 %1887, %v1010_v4   ;;  %v972_v4 = vmul.f32 1.2, %v1761_v21 }
 0x2b0   :  { %1130 = vperm.xlu0 %1887, %v1012_v7   ;;  %1125 = vperm.xlu1 %1888, %v1011_v8   ;;  %v973_v7 = vmul.f32 1.2, %v399_v24 }
 0x2b4   :  { %1110 = vperm.xlu0 %1887, %v1008_v9   ;;  %1115 = vperm.xlu1 %1888, %v1009_v10  }
 0x2b8   :  { %1100 = vperm.xlu0 %1887, %v1006_v11   ;;  %1105 = vperm.xlu1 %1888, %v1007_v12   ;;  %v1782_v12 = vpop.f32.mrf.mxu1 }
 0x2ba   :  { %v459_v33 = vpop.f32.mrf.mxu1 }
 0x2bc   :  { %1095 = vperm.xlu1 %1888, %v1005_v13  }
 0x307   :  { %v1071_v29 = vpop.permute.xlu0 %1070 }
 0x308   :  { %v1144_v49 = vadd.f32 %v1071_v29, %v976_v41  ;;  %v971_v29 = vmul.f32 1.2, %v389_v22  ;;  %v969_v41 = vmul.f32 1.2, %v2218_v20  ;;  %v966_v20 = vmul.f32 1.2, %v2208_v15 }
 0x309   :  { %v986_v15 = vmul.f32 1.2, %v1782_v12 }
 0x30a   :  { %v1168_v63 = vmax.f32 %v1144_v49, 0.0 }
 0x30b   :  { %v1061_v31 = vpop.permute.xlu0 %1060  ;;  %v1081_v32 = vpop.permute.xlu1 %1080 }
 0x30c   :  { %v1146_v42 = vadd.f32 %v1081_v32, %v978_v36  ;;  %v1142_v60 = vadd.f32 %v1061_v31, %v974_v48  ;;  %v1192_v13 = vmin.f32 %v1168_v63, 1.0 }
 0x30e   :  { %v1170_v51 = vmax.f32 %v1146_v42, 0.0  ;;  %v1166_v9 = vmax.f32 %v1142_v60, 0.0 }
 0x30f   :  { %v1051_v34 = vpop.permute.xlu0 %1050  ;;  %v1076_v35 = vpop.permute.xlu1 %1075 }
 0x310   :  { %v1145_v52 = vadd.f32 %v1076_v35, %v977_v44  ;;  %v1194_v62 = vmin.f32 %v1170_v51, 1.0  ;;  %v1140_v10 = vadd.f32 %v1051_v34, %v972_v4  ;;  %v1270_v34 = vsel %vm1236_vm5, %v1192_v13, 0.0 }
 0x311   :  { %v1190_v35 = vmin.f32 %v1166_v9, 1.0  ;;  %v985_v13 = vmul.f32 1.2, %v459_v33 }
 0x312   :  { %v1169_v3 = vmax.f32 %v1145_v52, 0.0  ;;  %v1276_v11 = vsel %vm1236_vm5, %v1194_v62, 0.0  ;;  %v1164_v24 = vmax.f32 %v1140_v10, 0.0 }
 0x313   :  { %v1041_v38 = vpop.permute.xlu0 %1040  ;;  %v1066_v39 = vpop.permute.xlu1 %1065  ;;  %v1264_v52 = vsel %vm1236_vm5, %v1190_v35, 0.0 }
 0x314   :  { %v1143_v0 = vadd.f32 %v1066_v39, %v975_v57  ;;  %v1193_v27 = vmin.f32 %v1169_v3, 1.0  ;;  %v1138_v31 = vadd.f32 %v1041_v38, %v970_v28  ;;  %v1188_v22 = vmin.f32 %v1164_v24, 1.0 }
 0x316   :  { %v1167_v23 = vmax.f32 %v1143_v0, 0.0  ;;  %v1162_v44 = vmax.f32 %v1138_v31, 0.0 }
 0x317   :  { %v1056_v45 = vpop.permute.xlu1 %1055  ;;  %v1091_v46 = vpop.permute.xlu0 %1090 }
 0x318   :  { %v1148_v47 = vadd.f32 %v1091_v46, %v980_v40  ;;  %v1141_v25 = vadd.f32 %v1056_v45, %v973_v7  ;;  %v1191_v36 = vmin.f32 %v1167_v23, 1.0  ;;  %v1273_v40 = vsel %vm1236_vm5, %v1193_v27, 0.0 }
 0x319   :  { %v1186_v17 = vmin.f32 %v1162_v44, 1.0 }
 0x31a   :  { %v1172_v53 = vmax.f32 %v1148_v47, 0.0  ;;  %v1165_v39 = vmax.f32 %v1141_v25, 0.0  ;;  %v1785_v47 = vpop.f32.mrf.mxu1  ;;  %v1267_v51 = vsel %vm1236_vm5, %v1191_v36, 0.0 }
 0x31b   :  { %v1046_v55 = vpop.permute.xlu1 %1045  ;;  %v1086_v56 = vpop.permute.xlu0 %1085 }
 0x31c   :  { %v1196_v58 = vmin.f32 %v1172_v53, 1.0  ;;  %v1147_v59 = vadd.f32 %v1086_v56, %v979_v54  ;;  %v1139_v32 = vadd.f32 %v1046_v55, %v971_v29  ;;  %v1189_v48 = vmin.f32 %v1165_v39, 1.0  ;;  %v469_v57 = vpop.f32.mrf.mxu1 }
 0x31d   :  { %v967_v53 = vmul.f32 1.2, %v2214_v18  ;;  %v988_v54 = vmul.f32 1.2, %v1785_v47  ;;  %v987_v18 = vmul.f32 1.2, %v469_v57 }
 0x31e   :  { %v1171_v1 = vmax.f32 %v1147_v59, 0.0  ;;  %v1282_v2 = vsel %vm1236_vm5, %v1196_v58, 0.0  ;;  %v1163_v45 = vmax.f32 %v1139_v32, 0.0  ;;  %v1258_v59 = vsel %vm1236_vm5, %v1188_v22, 0.0 }
 0x31f   :  { %v1036_v5 = vpop.permute.xlu1 %1035  ;;  %v1031_v6 = vpop.permute.xlu0 %1030  ;;  %1283 = vadd.xlane.f32.xlu0 %v1282_v2  ;;  %v1261_v0 = vsel %vm1236_vm5, %v1189_v48, 0.0 }
 0x320   :  { %v1195_v8 = vmin.f32 %v1171_v1, 1.0  ;;  %v1137_v38 = vadd.f32 %v1036_v5, %v969_v41  ;;  %v1136_v49 = vadd.f32 %v1031_v6, %v968_v19  ;;  %v1187_v55 = vmin.f32 %v1163_v45, 1.0 }
 0x321   :  { %v965_v1 = vmul.f32 1.2, %v2210_v16  ;;  %v1252_v6 = vsel %vm1236_vm5, %v1186_v17, 0.0  ;;  %v984_v16 = vmul.f32 1.2, %v2224_v50 }
 0x322   :  { %v1279_v26 = vsel %vm1236_vm5, %v1195_v8, 0.0  ;;  %v1161_v56 = vmax.f32 %v1137_v38, 0.0  ;;  %v1160_v60 = vmax.f32 %v1136_v49, 0.0  ;;  %v1255_v5 = vsel %vm1236_vm5, %v1187_v55, 0.0 }
 0x323   :  { %v1026_v21 = vpop.permute.xlu1 %1025  ;;  %v1021_v30 = vpop.permute.xlu0 %1020  ;;  %1277 = vadd.xlane.f32.xlu0 %v1276_v11  ;;  %1280 = vadd.xlane.f32.xlu1 %v1279_v26  ;;  %v982_v41 = vmul.f32 1.2, %v2220_v37 }
 0x324   :  { %v1135_v62 = vadd.f32 %v1026_v21, %v967_v53  ;;  %v1134_v63 = vadd.f32 %v1021_v30, %v966_v20  ;;  %v1185_v3 = vmin.f32 %v1161_v56, 1.0  ;;  %v1184_v7 = vmin.f32 %v1160_v60, 1.0 }
 0x326   :  { %v1159_v8 = vmax.f32 %v1135_v62, 0.0  ;;  %v1158_v9 = vmax.f32 %v1134_v63, 0.0  ;;  %v1249_v27 = vsel %vm1236_vm5, %v1185_v3, 0.0  ;;  %v1246_v30 = vsel %vm1236_vm5, %v1184_v7, 0.0  ;;  %v1232_v3 = vld [vmem:[%s2396_s3 + $0x1a8] sm:$0xff] }
 0x327   :  { %v1016_v42 = vpop.permute.xlu1 %1015  ;;  %1274 = vadd.xlane.f32.xlu0 %v1273_v40  ;;  %1271 = vadd.xlane.f32.xlu1 %v1270_v34  ;;  %v1121_v46 = vpop.permute.xlu0 %1120 }
 0x328   :  { %v1133_v4 = vadd.f32 %v1016_v42, %v965_v1  ;;  %v1154_v25 = vadd.f32 %v1121_v46, %v986_v15  ;;  %v1183_v28 = vmin.f32 %v1159_v8, 1.0  ;;  %v1182_v29 = vmin.f32 %v1158_v9, 1.0  ;;  %v1334_v1 = vld [vmem:[%s2399_s1] sm:$0x3]  ;;  %v1234_v15 = vld [vmem:[%s2396_s3 + $0x1b8] sm:$0xff]  ;;  %v1219_v8 = vld [vmem:[%s2396_s3 + $0x70] sm:$0xff] }
 0x329   :  { %v983_v42 = vmul.f32 1.2, %v2226_v61  ;;  %1874 = vmatpush3.msra.mxu1 %v1234_v15  ;;  %v1218_v9 = vld [vmem:[%s2396_s3 + $0x68] sm:$0xff]  ;;  %v1224_v15 = vld [vmem:[%s2396_s3 + $0x98] sm:$0xff] }
 0x32a   :  { %v1157_v23 = vmax.f32 %v1133_v4, 0.0  ;;  %v1178_v31 = vmax.f32 %v1154_v25, 0.0  ;;  %v1243_v36 = vsel %vm1236_vm5, %v1183_v28, 0.0  ;;  %v1240_v39 = vsel %vm1236_vm5, %v1182_v29, 0.0  ;;  %1875 = vmatprep.subr.mxu1 %v1889_v14  ;;  %v1231_v4 = vld [vmem:[%s2396_s3 + $0x1a0] sm:$0xff]  ;;  %v1215_v28 = vld [vmem:[%s2396_s3 + $0x50] sm:$0xff] }
 0x32b   :  { %1268 = vadd.xlane.f32.xlu0 %v1267_v51  ;;  %1265 = vadd.xlane.f32.xlu1 %v1264_v52  ;;  %v1126_v58 = vpop.permute.xlu1 %1125  ;;  %v1131_v2 = vpop.permute.xlu0 %1130  ;;  %v981_v51 = vmul.f32 1.2, %v2222_v43 }
 0x32c   :  { %v1156_v10 = vadd.f32 %v1131_v2, %v988_v54  ;;  %v1155_v12 = vadd.f32 %v1126_v58, %v987_v18  ;;  %v1181_v24 = vmin.f32 %v1157_v23, 1.0  ;;  %v1202_v19 = vmin.f32 %v1178_v31, 1.0  ;;  %v1233_v18 = vld [vmem:[%s2396_s3 + $0x1b0] sm:$0xff] }
 0x32d   :  { %1876 = vmatpush3.msra.mxu1 %v1233_v18 }
 0x32e   :  { %v1180_v21 = vmax.f32 %v1156_v10, 0.0  ;;  %v1179_v32 = vmax.f32 %v1155_v12, 0.0  ;;  %v1237_v45 = vsel %vm1236_vm5, %v1181_v24, 0.0  ;;  %v1300_v37 = vsel %vm1236_vm5, %v1202_v19, 0.0  ;;  %1877 = vmatprep.subr.mxu1 %v1889_v14  ;;  %v1216_v12 = vld [vmem:[%s2396_s3 + $0x58] sm:$0xff] }
 0x32f   :  { %1262 = vadd.xlane.f32.xlu0 %v1261_v0  ;;  %1259 = vadd.xlane.f32.xlu1 %v1258_v59  ;;  %v1116_v11 = vpop.permute.xlu1 %1115  ;;  %v1111_v26 = vpop.permute.xlu0 %1110  ;;  %v2265_v0 = vld.sshfl [vmem:[%s2400_s4] sm:$0x33 pattern:$0x76325410] }
 0x330   :  { %v1152_v34 = vadd.f32 %v1111_v26, %v984_v16  ;;  %v1204_v50 = vmin.f32 %v1180_v21, 1.0  ;;  %v1153_v33 = vadd.f32 %v1116_v11, %v985_v13  ;;  %v1203_v22 = vmin.f32 %v1179_v32, 1.0  ;;  %1878 = vmatpush3.msra.mxu1 %v1232_v3  ;;  %v1217_v13 = vld [vmem:[%s2396_s3 + $0x60] sm:$0xff] }
 0x331   :  { %v1353_v2 = vcombine.high %v2265_v0, %v2265_v0  ;;  %1879 = vmatprep.subr.mxu1 %v1889_v14  ;;  %v1213_v32 = vld [vmem:[%s2396_s3 + $0x40] sm:$0xff] }
 0x332   :  { %v1176_v44 = vmax.f32 %v1152_v34, 0.0  ;;  %v1177_v38 = vmax.f32 %v1153_v33, 0.0  ;;  %v1306_v48 = vsel %vm1236_vm5, %v1204_v50, 0.0  ;;  %v1303_v61 = vsel %vm1236_vm5, %v1203_v22, 0.0  ;;  %1880 = vmatpush3.msra.mxu1 %v1231_v4  ;;  %v1212_v50 = vld [vmem:[%s2396_s3 + $0x38] sm:$0xff] }
 0x333   :  { %1256 = vadd.xlane.f32.xlu0 %v1255_v5  ;;  %1253 = vadd.xlane.f32.xlu1 %v1252_v6  ;;  %v1106_v35 = vpop.permute.xlu1 %1105  ;;  %v1101_v40 = vpop.permute.xlu0 %1100  ;;  %v1220_v5 = vld [vmem:[%s2396_s3 + $0x78] sm:$0xff] }
 0x334   :  { %v1150_v46 = vadd.f32 %v1101_v40, %v982_v41  ;;  %v1151_v47 = vadd.f32 %v1106_v35, %v983_v42  ;;  %v1200_v52 = vmin.f32 %v1176_v44, 1.0  ;;  %v1201_v20 = vmin.f32 %v1177_v38, 1.0  ;;  %1593 = vmatprep.mubr.msk.f32.mxu0 %vm1355_vm6, %v1353_v2  ;;  %v1210_v42 = vld [vmem:[%s2396_s3 + $0x28] sm:$0xff]  ;;  %v1209_v44 = vld [vmem:[%s2396_s3 + $0x20] sm:$0xff] }
 0x336   :  { %v1174_v53 = vmax.f32 %v1150_v46, 0.0  ;;  %v1175_v54 = vmax.f32 %v1151_v47, 0.0  ;;  %v1294_v55 = vsel %vm1236_vm5, %v1200_v52, 0.0  ;;  %v1297_v59 = vsel %vm1236_vm5, %v1201_v20, 0.0  ;;  %v1208_v46 = vld [vmem:[%s2396_s3 + $0x18] sm:$0xff] }
 0x337   :  { %1250 = vadd.xlane.f32.xlu0 %v1249_v27  ;;  %1247 = vadd.xlane.f32.xlu1 %v1246_v30  ;;  %v1096_v49 = vpop.permute.xlu1 %1095  ;;  %v1214_v30 = vld [vmem:[%s2396_s3 + $0x48] sm:$0xff] }
 0x338   :  { %v1149_v17 = vadd.f32 %v1096_v49, %v981_v51  ;;  %v1198_v56 = vmin.f32 %v1174_v53, 1.0  ;;  %v1199_v57 = vmin.f32 %v1175_v54, 1.0  ;;  %v1207_v49 = vld [vmem:[%s2396_s3 + $0x10] sm:$0xff]  ;;  %v1205_v53 = vld [vmem:[%s2396_s3] sm:$0xff] }
 0x33a   :  { %v1173_v58 = vmax.f32 %v1149_v17, 0.0  ;;  %v1288_v60 = vsel %vm1236_vm5, %v1198_v56, 0.0  ;;  %v1291_v62 = vsel %vm1236_vm5, %v1199_v57, 0.0 }
 0x33b   :  { %1244 = vadd.xlane.f32.xlu0 %v1243_v36  ;;  %1241 = vadd.xlane.f32.xlu1 %v1240_v39  ;;  %v1211_v39 = vld [vmem:[%s2396_s3 + $0x30] sm:$0xff] }
 0x33c   :  { %v1197_v43 = vmin.f32 %v1173_v58, 1.0  ;;  %v1227_v58 = vld [vmem:[%s2396_s3 + $0xb0] sm:$0xff] }
 0x33e   :  { %v1285_v63 = vsel %vm1236_vm5, %v1197_v43, 0.0  ;;  %v1226_v43 = vld [vmem:[%s2396_s3 + $0xa8] sm:$0xff] }
 0x33f   :  { %1238 = vadd.xlane.f32.xlu0 %v1237_v45  ;;  %1307 = vadd.xlane.f32.xlu1 %v1306_v48 }
 0x343   :  { %1301 = vadd.xlane.f32.xlu1 %v1300_v37  ;;  %1304 = vadd.xlane.f32.xlu0 %v1303_v61  ;;  %v1206_v37 = vld [vmem:[%s2396_s3 + $0x8] sm:$0xff] }
 0x347   :  { %1295 = vadd.xlane.f32.xlu1 %v1294_v55  ;;  %1298 = vadd.xlane.f32.xlu0 %v1297_v59  ;;  %v1228_v55 = vld [vmem:[%s2396_s3 + $0xb8] sm:$0xff] }
 0x34b   :  { %1289 = vadd.xlane.f32.xlu1 %v1288_v60  ;;  %1292 = vadd.xlane.f32.xlu0 %v1291_v62 }
 0x34f   :  { %1286 = vadd.xlane.f32.xlu0 %v1285_v63 }
 0x35c   :  { %1337 = vperm.xlu1 %1888, %v1334_v1   ;;  %v1225_v1 = vld [vmem:[%s2396_s3 + $0xa0] sm:$0xff] }
 0x3a8   :  { %v1284_v6 = vpop.xlane.xlu0 %1283 }
 0x3a9   :  { %v1325_v7 = vmul.f32 %v1284_v6, %v1220_v5  ;;  %v1223_v5 = vld [vmem:[%s2396_s3 + $0x90] sm:$0xff] }
 0x3ab   :  { %1359 = vmatpush1.msra.mxu0 %v1325_v7  ;;  %v1222_v7 = vld [vmem:[%s2396_s3 + $0x88] sm:$0xff] }
 0x3ac   :  { %v1278_v10 = vpop.xlane.xlu0 %1277  ;;  %v1281_v11 = vpop.xlane.xlu1 %1280  ;;  %1360 = vmatprep.subr.mxu0 %v1889_v14 }
 0x3ad   :  { %v1324_v16 = vmul.f32 %v1281_v11, %v1219_v8  ;;  %v1323_v23 = vmul.f32 %v1278_v10, %v1218_v9  ;;  %v1221_v11 = vld [vmem:[%s2396_s3 + $0x80] sm:$0xff] }
 0x3af   :  { %1361 = vmatpush1.msra.mxu0 %v1324_v16 }
 0x3b0   :  { %v1275_v25 = vpop.xlane.xlu0 %1274  ;;  %1362 = vmatprep.subr.mxu0 %v1889_v14  ;;  %v1272_v26 = vpop.xlane.xlu1 %1271 }
 0x3b1   :  { %v1322_v27 = vmul.f32 %v1275_v25, %v1217_v13  ;;  %1363 = vmatpush1.msra.mxu0 %v1323_v23  ;;  %v1321_v29 = vmul.f32 %v1272_v26, %v1216_v12  ;;  %v1591_v25 = vld [vmem:[%s2396_s3 + $0x1c0] ss:$0 sm:$0xff] }
 0x3b2   :  { %1364 = vmatprep.subr.mxu0 %v1889_v14 }
 0x3b3   :  { %1365 = vmatpush1.msra.mxu0 %v1322_v27  ;;  %v1594_v27 = vld [vmem:[%s2396_s3 + $0x1c8] ss:$0 sm:$0xff] }
 0x3b4   :  { %v1269_v21 = vpop.xlane.xlu0 %1268  ;;  %1366 = vmatprep.subr.mxu0 %v1889_v14  ;;  %v1266_v24 = vpop.xlane.xlu1 %1265 }
 0x3b5   :  { %v1320_v31 = vmul.f32 %v1269_v21, %v1215_v28  ;;  %1367 = vmatpush1.msra.mxu0 %v1321_v29  ;;  %v1319_v34 = vmul.f32 %v1266_v24, %v1214_v30 }
 0x3b6   :  { %1368 = vmatprep.subr.mxu0 %v1889_v14 }
 0x3b7   :  { %1369 = vmatpush1.msra.mxu0 %v1320_v31 }
 0x3b8   :  { %v1263_v35 = vpop.xlane.xlu0 %1262  ;;  %1370 = vmatprep.subr.mxu0 %v1889_v14  ;;  %v1260_v33 = vpop.xlane.xlu1 %1259 }
 0x3b9   :  { %v1318_v36 = vmul.f32 %v1263_v35, %v1213_v32  ;;  %1371 = vmatpush1.msra.mxu0 %v1319_v34  ;;  %v1317_v40 = vmul.f32 %v1260_v33, %v1212_v50 }
 0x3ba   :  { %1372 = vmatprep.subr.mxu0 %v1889_v14 }
 0x3bb   :  { %1373 = vmatpush1.msra.mxu0 %v1318_v36 }
 0x3bc   :  { %v1257_v41 = vpop.xlane.xlu0 %1256  ;;  %1374 = vmatprep.subr.mxu0 %v1889_v14  ;;  %v1254_v19 = vpop.xlane.xlu1 %1253 }
 0x3bd   :  { %v1316_v22 = vmul.f32 %v1257_v41, %v1211_v39  ;;  %1375 = vmatpush1.msra.mxu0 %v1317_v40  ;;  %v1315_v45 = vmul.f32 %v1254_v19, %v1210_v42 }
 0x3be   :  { %1376 = vmatprep.subr.mxu0 %v1889_v14 }
 0x3bf   :  { %1377 = vmatpush1.msra.mxu0 %v1316_v22 }
 0x3c0   :  { %v1251_v38 = vpop.xlane.xlu0 %1250  ;;  %1378 = vmatprep.subr.mxu0 %v1889_v14  ;;  %v1248_v47 = vpop.xlane.xlu1 %1247 }
 0x3c1   :  { %v1314_v48 = vmul.f32 %v1251_v38, %v1209_v44  ;;  %1379 = vmatpush1.msra.mxu0 %v1315_v45  ;;  %v1313_v51 = vmul.f32 %v1248_v47, %v1208_v46 }
 0x3c2   :  { %1380 = vmatprep.subr.mxu0 %v1889_v14 }
 0x3c3   :  { %1381 = vmatpush1.msra.mxu0 %v1314_v48 }
 0x3c4   :  { %v1245_v52 = vpop.xlane.xlu0 %1244  ;;  %1382 = vmatprep.subr.mxu0 %v1889_v14  ;;  %v1242_v61 = vpop.xlane.xlu1 %1241 }
 0x3c5   :  { %v1312_v20 = vmul.f32 %v1245_v52, %v1207_v49  ;;  %1383 = vmatpush1.msra.mxu0 %v1313_v51  ;;  %v1311_v54 = vmul.f32 %v1242_v61, %v1206_v37 }
 0x3c6   :  { %1384 = vmatprep.subr.mxu0 %v1889_v14 }
 0x3c7   :  { %1385 = vmatpush1.msra.mxu0 %v1312_v20 }
 0x3c8   :  { %v1239_v17 = vpop.xlane.xlu0 %1238  ;;  %1386 = vmatprep.subr.mxu0 %v1889_v14  ;;  %v1308_v56 = vpop.xlane.xlu1 %1307 }
 0x3c9   :  { %v1310_v57 = vmul.f32 %v1239_v17, %v1205_v53  ;;  %1387 = vmatpush1.msra.mxu0 %v1311_v54  ;;  %v1333_v59 = vmul.f32 %v1308_v56, %v1228_v55 }
 0x3ca   :  { %1388 = vmatprep.subr.mxu0 %v1889_v14 }
 0x3cb   :  { %1389 = vmatpush1.msra.mxu0 %v1310_v57 }
 0x3cc   :  { %1406 = vmatprep.subr.mxu0 %v1889_v14  ;;  %v1302_v60 = vpop.xlane.xlu1 %1301  ;;  %v1305_v62 = vpop.xlane.xlu0 %1304 }
 0x3cd   :  { %v1332_v63 = vmul.f32 %v1305_v62, %v1227_v58  ;;  %1407 = vmatpush2.msra.mxu0 %v1333_v59  ;;  %v1331_v2 = vmul.f32 %v1302_v60, %v1226_v43 }
 0x3ce   :  { %1408 = vmatprep.subr.mxu0 %v1889_v14 }
 0x3cf   :  { %1409 = vmatpush2.msra.mxu0 %v1332_v63 }
 0x3d0   :  { %v1296_v18 = vpop.xlane.xlu1 %1295  ;;  %1410 = vmatprep.subr.mxu0 %v1889_v14  ;;  %v1299_v3 = vpop.xlane.xlu0 %1298 }
 0x3d1   :  { %v1330_v4 = vmul.f32 %v1299_v3, %v1225_v1  ;;  %1411 = vmatpush2.msra.mxu0 %v1331_v2  ;;  %v1329_v6 = vmul.f32 %v1296_v18, %v1224_v15 }
 0x3d2   :  { %1412 = vmatprep.subr.mxu0 %v1889_v14 }
 0x3d3   :  { %1413 = vmatpush2.msra.mxu0 %v1330_v4 }
 0x3d4   :  { %v1290_v8 = vpop.xlane.xlu1 %1289  ;;  %1414 = vmatprep.subr.mxu0 %v1889_v14  ;;  %v1293_v9 = vpop.xlane.xlu0 %1292 }
 0x3d5   :  { %v1328_v10 = vmul.f32 %v1293_v9, %v1223_v5  ;;  %1415 = vmatpush2.msra.mxu0 %v1329_v6  ;;  %v1327_v16 = vmul.f32 %v1290_v8, %v1222_v7 }
 0x3d6   :  { %1416 = vmatprep.subr.mxu0 %v1889_v14 }
 0x3d7   :  { %1417 = vmatpush2.msra.mxu0 %v1328_v10 }
 0x3d8   :  { %1418 = vmatprep.subr.mxu0 %v1889_v14  ;;  %v1287_v13 = vpop.xlane.xlu0 %1286  ;;  %v1338_v12 = vpop.permute.xlu1 %1337 }
 0x3d9   :  { %v1326_v23 = vmul.f32 %v1287_v13, %v1221_v11  ;;  %1419 = vmatpush2.msra.mxu0 %v1327_v16  ;;  %v1344_v26 = vmul.f32 %v1591_v25, %v1338_v12 }
 0x3da   :  { %1420 = vmatprep.subr.mxu0 %v1889_v14  ;;  %v1595_v14 = vld [vmem:[%s2396_s3 + $0x1d0] ss:$0 sm:$0xff] }
 0x3db   :  { %1421 = vmatpush2.msra.mxu0 %v1326_v23 }
 0x3dc   :  { %1423 = vmatmul.mubr.f32.vlgmr.msra.gmra.mxu0 %v2265_v0 }
 0x49c   :  { %v1424_v28 = vpop.f32.mrf.mxu0 }
 0x49d   :  { %v1425_v29 = vadd.f32 %v1424_v28, %v1344_v26 }
 0x49e   :  { %v1426_v21 = vpop.f32.mrf.mxu0 }
 0x49f   :  { %v1432_v30 = vadd.f32 %v1594_v27, %v1425_v29 }
 0x4a1   :  { %v1433_v24 = vmax.f32 %v1432_v30, 0.0 }
 0x4a3   :  { %1882 = vmatmul.mubr.msk.f32.vlgmr.msra.gmra.mxu1 %vm1236_vm5, %v1433_v24 }
 0x563   :  { %v1507_v0 = vpop.f32.mrf.mxu1 }
 0x564   :  { %v1508_v31 = vadd.f32 %v1595_v14, %v1507_v0 }
 0x565   :  { %v1883_v32 = vpop.f32.mrf.mxu1 }
 0x566   :  { %1512 = vst.msk [vmem:[%s2401_s5] sm:$0x3] %vm1511_vm7, %v1508_v31 }

</bundles_post_ra>
